<compile_context>
chip_gen: v7x
topology: tpu7x:2x2x1
jax: 0.10.0
libtpu: 0.0.40
codegen_flags: <defaults>
</compile_context>

<pallas_src>
import functools

import jax
import jax.numpy as jnp
from jax.experimental import pallas as pl
from jax.experimental.pallas import tpu as pltpu

OUT_LANES = 128   # lane-dense output slab: actor in lanes [0:act_dim], critic in lane act_dim
_MIN_TILE = 16    # batch-tile granularity (clean bf16 sublane packing)


def _round_up(x, m):
    return ((x + m - 1) // m) * m


def actor_critic_kernel(x_ref, w1_ref, b1_ref, w2_ref, b2_ref, o_ref):
    """Fused ActorCritic forward for one batch tile.

    The wrapper has already folded the Identity-activation shared trunk into the
    (actor|critic)-concatenated hidden layer and stacked the two output heads into a
    single lane-padded [h_pi+h_vf, 128] weight, so the whole network is:
        h   = tanh(x @ W1f + b1f)       # [tile, h_pi+h_vf]
        out = h @ W2stack + b2stack     # [tile, 128], single unmasked full-lane store
    MXU accumulation and the tanh/bias epilogue stay f32 on all chips (v5e has no
    bf16 VPU/EUP); only x / W1f may stream in bf16.
    """
    h = jnp.tanh(jnp.dot(x_ref[...], w1_ref[...],
                         preferred_element_type=jnp.float32) + b1_ref[...])
    out = jnp.dot(h, w2_ref[...], preferred_element_type=jnp.float32) + b2_ref[...]
    o_ref[...] = out.astype(o_ref.dtype)


@functools.partial(jax.jit,
                   static_argnames=("tile_b", "compute_dtype", "out_dtype"))
def actor_critic_forward(x, params, *, tile_b=1024,
                         compute_dtype=jnp.bfloat16,
                         out_dtype=jnp.bfloat16):
    """Fused ActorCritic forward: x [B, obs_dim] -> (actor [B, act_dim], critic [B, 1]).

    compute_dtype: streaming dtype for the fused hidden-layer weight (bf16 on v6e/v7x,
    f32 for strict v5e-era numerics).  Pass x already in the streaming dtype you want
    (the wrapper does not recast it, to avoid an extra HBM pass over x).
    out_dtype: dtype of the 128-lane output slab (bf16 halves writeback traffic).
    """
    f32 = jnp.float32
    B, obs_dim = x.shape

    ws, bs = params["ws"], params["bs"]
    wa1, ba1, wa2, ba2 = params["wa1"], params["ba1"], params["wa2"], params["ba2"]
    wc1, bc1, wc2, bc2 = params["wc1"], params["bc1"], params["wc2"], params["bc2"]
    std, mean = params["critic_std"], params["critic_mean"]

    h_pi = wa1.shape[1]
    h_vf = wc1.shape[1]
    h_cat = h_pi + h_vf
    act_dim = wa2.shape[1]
    assert act_dim + 1 <= OUT_LANES, "actor+critic outputs must fit in one 128-lane slab"

    # --- head fusion + trunk folding (exact in f32, one-time tiny wrapper cost) ----
    # 1) concatenate actor/critic hidden layers: [h_sh, h_pi+h_vf]
    w1cat = jnp.concatenate([wa1.astype(f32), wc1.astype(f32)], axis=1)
    b1cat = jnp.concatenate([ba1.astype(f32), bc1.astype(f32)], axis=1)
    # 2) fold the Identity-activation shared trunk into that layer
    w1f = ws.astype(f32) @ w1cat                      # [obs_dim, h_cat]
    b1f = bs.astype(f32) @ w1cat + b1cat              # [1, h_cat]
    # 3) stack the two output heads into one lane-padded weight; fold the critic's
    #    (std, mean) buffers into the critic column.  Kept f32 even when streaming
    #    bf16 (review: folding std before a bf16 cast loses precision; [h,128] f32
    #    matmul input is negligible here).
    w2 = jnp.zeros((h_cat, OUT_LANES), f32)
    w2 = w2.at[:h_pi, :act_dim].set(wa2.astype(f32))
    w2 = w2.at[h_pi:, act_dim:act_dim + 1].set(wc2.astype(f32) * std)
    b2 = jnp.zeros((1, OUT_LANES), f32)
    b2 = b2.at[:, :act_dim].set(ba2.astype(f32))
    b2 = b2.at[:, act_dim:act_dim + 1].set(bc2.astype(f32) * std + mean)

    # --- batch tiling: boundary-clipped grid, no jnp.pad copy of x -----------------
    if B <= tile_b:
        if B >= 2 * _MIN_TILE:
            # Split into >=2 tiles so both v7x TensorCores get work.
            tile = _round_up(-(-B // 2), _MIN_TILE)
        else:
            tile = _MIN_TILE                          # tiny batch: single (padded) tile
    else:
        tile = _round_up(tile_b, _MIN_TILE)
    grid = (pl.cdiv(B, tile),)
    # Boundary block: OOB input rows are undefined but only flow into their own
    # (clipped, never-written) output rows — safe because there is no cross-row
    # reduction inside the kernel.

    w1s = w1f.astype(compute_dtype)                   # streaming dtype for W1f
    args = (x, w1s, b1f, w2, b2)

    # --- advisory cost estimate -----------------------------------------------------
    flops = 2 * B * (obs_dim * h_cat + h_cat * OUT_LANES)
    transcendentals = B * h_cat
    param_bytes = sum(int(a.size) * a.dtype.itemsize for a in args[1:])
    bytes_accessed = (int(x.size) * x.dtype.itemsize
                      + B * OUT_LANES * jnp.dtype(out_dtype).itemsize
                      + param_bytes)

    # Parameters are tiny (<40 KB) and block-invariant -> resident VMEM, no per-step
    # DMA.  Only the x stream and the output slab are tiled over the batch.
    weight_spec = pl.BlockSpec(memory_space=pltpu.MemorySpace.VMEM)

    out = pl.pallas_call(
        actor_critic_kernel,
        out_shape=jax.ShapeDtypeStruct((B, OUT_LANES), out_dtype),
        grid=grid,
        in_specs=[pl.BlockSpec((tile, obs_dim), lambda i: (i, 0))]
                 + [weight_spec] * 4,
        out_specs=pl.BlockSpec((tile, OUT_LANES), lambda i: (i, 0)),
        compiler_params=pltpu.CompilerParams(
            dimension_semantics=("parallel",)),       # shards batch tiles across v7x TCs
        cost_estimate=pl.CostEstimate(
            flops=int(flops),
            transcendentals=int(transcendentals),
            bytes_accessed=int(bytes_accessed)),
    )(*args)

    actor_out = out[:, :act_dim].astype(f32)
    critic_out = out[:, act_dim:act_dim + 1].astype(f32)
    return actor_out, critic_out


def init_actor_critic_params(key, obs_dim, pi_sizes, vf_sizes, act_dim):
    """PyTorch-Linear-style U(-1/sqrt(fan_in), 1/sqrt(fan_in)) init for the
    shared-layers ActorCritic (continuous / MLPGaussian actor)."""
    assert len(pi_sizes) > 1 and len(vf_sizes) > 1
    assert pi_sizes[-2] == vf_sizes[-2], \
        "shared trunk output must match the critic head's input width"
    f32 = jnp.float32

    def linear(key, fan_in, fan_out):
        kw, kb = jax.random.split(key)
        bound = 1.0 / jnp.sqrt(fan_in)
        w = jax.random.uniform(kw, (fan_in, fan_out), f32, -bound, bound)
        b = jax.random.uniform(kb, (1, fan_out), f32, -bound, bound)
        return w, b

    keys = jax.random.split(key, 5)
    ws, bs = linear(keys[0], obs_dim, pi_sizes[-2])          # shared trunk (Identity act)
    wa1, ba1 = linear(keys[1], pi_sizes[-2], pi_sizes[-1])   # actor hidden (+Tanh)
    wa2, ba2 = linear(keys[2], pi_sizes[-1], act_dim)        # actor output
    wc1, bc1 = linear(keys[3], vf_sizes[-2], vf_sizes[-1])   # critic hidden (+Tanh)
    wc2, bc2 = linear(keys[4], vf_sizes[-1], 1)              # critic output

    return {
        "ws": ws, "bs": bs,
        "wa1": wa1, "ba1": ba1, "wa2": wa2, "ba2": ba2,
        "wc1": wc1, "bc1": bc1, "wc2": wc2, "bc2": bc2,
        "critic_std": jnp.array(1.0, f32),   # MLPCritic registered buffers
        "critic_mean": jnp.array(0.0, f32),
        "log_std": jnp.full((act_dim,), 3.0, f32),  # MLPGaussian param; unused in forward()
    }


def reference_forward(x, params):
    z = x @ params["ws"] + params["bs"]
    ha = jnp.tanh(z @ params["wa1"] + params["ba1"])
    actor = ha @ params["wa2"] + params["ba2"]
    hc = jnp.tanh(z @ params["wc1"] + params["bc1"])
    critic = (hc @ params["wc2"] + params["bc2"]) * params["critic_std"] \
             + params["critic_mean"]
    return actor, critic


if __name__ == "__main__":
    # Small shapes consistent with the module: obs_dim=16, pi=vf=[32,32], act_dim=8.
    obs_dim, act_dim = 16, 8
    hidden_sizes = {"pi": [32, 32], "vf": [32, 32]}
    batch = 16

    key = jax.random.PRNGKey(0)
    key, kx = jax.random.split(key)
    x = jax.random.normal(kx, (batch, obs_dim), dtype=jnp.float32)
    params = init_actor_critic_params(
        key, obs_dim, hidden_sizes["pi"], hidden_sizes["vf"], act_dim)

    a_ref, c_ref = reference_forward(x, params)

    # 1) f32 streaming + f32 output slab (v5e-strict numerics), tight check.
    a32, c32 = actor_critic_forward(x, params, compute_dtype=jnp.float32,
                                    out_dtype=jnp.float32)
    jax.block_until_ready((a32, c32))
    assert a32.shape == (batch, act_dim) and c32.shape == (batch, 1)
    assert jnp.allclose(a32, a_ref, atol=1e-4, rtol=1e-4), "actor mismatch (f32)"
    assert jnp.allclose(c32, c_ref, atol=1e-4, rtol=1e-4), "critic mismatch (f32)"

    # 2) Default fast path (v6e/v7x): bf16 x / W1f streaming + bf16 output slab,
    #    f32 accumulation and epilogue.  Looser tolerance.
    a16, c16 = actor_critic_forward(x.astype(jnp.bfloat16), params)
    jax.block_until_ready((a16, c16))
    assert jnp.allclose(a16, a_ref, atol=5e-2, rtol=5e-2), "actor mismatch (bf16)"
    assert jnp.allclose(c16, c_ref, atol=5e-2, rtol=5e-2), "critic mismatch (bf16)"

    # 3) Multi-step grid with a non-divisible batch: boundary-clipped last block
    #    (no jnp.pad copy), >=2 grid steps for v7x dual-TC sharding.
    key, kx2 = jax.random.split(key)
    x_big = jax.random.normal(kx2, (300, obs_dim), dtype=jnp.float32)
    a_b, c_b = actor_critic_forward(x_big, params, tile_b=128,
                                    compute_dtype=jnp.float32,
                                    out_dtype=jnp.float32)
    jax.block_until_ready((a_b, c_b))
    a_bref, c_bref = reference_forward(x_big, params)
    assert a_b.shape == (300, act_dim) and c_b.shape == (300, 1)
    assert jnp.allclose(a_b, a_bref, atol=1e-4, rtol=1e-4), "actor mismatch (tiled)"
    assert jnp.allclose(c_b, c_bref, atol=1e-4, rtol=1e-4), "critic mismatch (tiled)"

    # TODO(synk): get_action / get_logprob (torch.distributions sampling, softplus /
    # softmax policy heads) are not part of forward() and stay in plain JAX outside
    # the kernel.

    print("KERNEL_OK")
</pallas_src>

<mosaic_0001>
module attributes {stable_mosaic.version = 11 : i64} {
  func.func @actor_critic_kernel(%arg0: i32, %arg1: memref<16x16xf32, #tpu.memory_space<vmem>>, %arg2: memref<16x64xf32, #tpu.memory_space<vmem>>, %arg3: memref<1x64xf32, #tpu.memory_space<vmem>>, %arg4: memref<64x128xf32, #tpu.memory_space<vmem>>, %arg5: memref<1x128xf32, #tpu.memory_space<vmem>>, %arg6: memref<16x128xf32, #tpu.memory_space<vmem>>) attributes {dimension_semantics = [#tpu.dimension_semantics<parallel>], iteration_bounds = array<i64: 1>, scalar_prefetch = 0 : i64, scratch_operands = 0 : i64, tpu.core_type = #tpu.core_type<tc>, window_params = [{transform_indices = @transform_0, window_bounds = array<i64: 16, 16>}, {pipeline_mode = #tpu.pipeline_mode<synchronous>, transform_indices = @transform_1, window_bounds = array<i64: 16, 64>}, {pipeline_mode = #tpu.pipeline_mode<synchronous>, transform_indices = @transform_2, window_bounds = array<i64: 1, 64>}, {pipeline_mode = #tpu.pipeline_mode<synchronous>, transform_indices = @transform_3, window_bounds = array<i64: 64, 128>}, {pipeline_mode = #tpu.pipeline_mode<synchronous>, transform_indices = @transform_4, window_bounds = array<i64: 1, 128>}, {transform_indices = @transform_5, window_bounds = array<i64: 16, 128>}]} {
    %c0 = arith.constant 0 : index
    %c0_0 = arith.constant 0 : index
    %0 = vector.load %arg1[%c0, %c0_0] : memref<16x16xf32, #tpu.memory_space<vmem>>, vector<16x16xf32>
    %c0_1 = arith.constant 0 : index
    %c0_2 = arith.constant 0 : index
    %1 = vector.load %arg2[%c0_1, %c0_2] : memref<16x64xf32, #tpu.memory_space<vmem>>, vector<16x64xf32>
    %cst = arith.constant dense<0.000000e+00> : vector<16x64xf32>
    %2 = tpu.matmul %0, %1, %cst {dimension_numbers = #tpu.dot_dimension_numbers<[1], [0], [0], [1], [0, 0, 1, 1], [], []>} : vector<16x16xf32>, vector<16x64xf32>, vector<16x64xf32> -> vector<16x64xf32>
    %c0_3 = arith.constant 0 : index
    %c0_4 = arith.constant 0 : index
    %3 = vector.load %arg3[%c0_3, %c0_4] : memref<1x64xf32, #tpu.memory_space<vmem>>, vector<1x64xf32>
    %4 = vector.broadcast %3 : vector<1x64xf32> to vector<16x64xf32>
    %5 = arith.addf %2, %4 : vector<16x64xf32>
    %6 = math.tanh %5 : vector<16x64xf32>
    %c0_5 = arith.constant 0 : index
    %c0_6 = arith.constant 0 : index
    %7 = vector.load %arg4[%c0_5, %c0_6] : memref<64x128xf32, #tpu.memory_space<vmem>>, vector<64x128xf32>
    %cst_7 = arith.constant dense<0.000000e+00> : vector<16x128xf32>
    %8 = tpu.matmul %6, %7, %cst_7 {dimension_numbers = #tpu.dot_dimension_numbers<[1], [0], [0], [1], [0, 0, 1, 1], [], []>} : vector<16x64xf32>, vector<64x128xf32>, vector<16x128xf32> -> vector<16x128xf32>
    %c0_8 = arith.constant 0 : index
    %c0_9 = arith.constant 0 : index
    %9 = vector.load %arg5[%c0_8, %c0_9] : memref<1x128xf32, #tpu.memory_space<vmem>>, vector<1x128xf32>
    %10 = vector.broadcast %9 : vector<1x128xf32> to vector<16x128xf32>
    %11 = arith.addf %8, %10 : vector<16x128xf32>
    %c0_10 = arith.constant 0 : index
    %c0_11 = arith.constant 0 : index
    %12 = vector.load %arg6[%c0_10, %c0_11] : memref<16x128xf32, #tpu.memory_space<vmem>>, vector<16x128xf32>
    tpu.vector_store %arg6[%c0_10, %c0_11], %11 {strides = array<i32>} : memref<16x128xf32, #tpu.memory_space<vmem>>, vector<16x128xf32>,
    return
  }
  func.func @transform_0(%arg0: i32) -> (i32, i32) {
    %c0_i32 = arith.constant 0 : i32
    %c0_i32_0 = arith.constant 0 : i32
    return %arg0, %c0_i32 : i32, i32
  }
  func.func @transform_1(%arg0: i32) -> (i32, i32) {
    %c0_i32 = arith.constant 0 : i32
    %c0_i32_0 = arith.constant 0 : i32
    %c0_i32_1 = arith.constant 0 : i32
    return %c0_i32, %c0_i32_0 : i32, i32
  }
  func.func @transform_2(%arg0: i32) -> (i32, i32) {
    %c0_i32 = arith.constant 0 : i32
    %c0_i32_0 = arith.constant 0 : i32
    %c0_i32_1 = arith.constant 0 : i32
    return %c0_i32, %c0_i32_0 : i32, i32
  }
  func.func @transform_3(%arg0: i32) -> (i32, i32) {
    %c0_i32 = arith.constant 0 : i32
    %c0_i32_0 = arith.constant 0 : i32
    %c0_i32_1 = arith.constant 0 : i32
    return %c0_i32, %c0_i32_0 : i32, i32
  }
  func.func @transform_4(%arg0: i32) -> (i32, i32) {
    %c0_i32 = arith.constant 0 : i32
    %c0_i32_0 = arith.constant 0 : i32
    %c0_i32_1 = arith.constant 0 : i32
    return %c0_i32, %c0_i32_0 : i32, i32
  }
  func.func @transform_5(%arg0: i32) -> (i32, i32) {
    %c0_i32 = arith.constant 0 : i32
    %c0_i32_0 = arith.constant 0 : i32
    return %arg0, %c0_i32 : i32, i32
  }
}

</mosaic_0001>

<bundles_post_ra>
// kernel: actor_critic_forward.1
= control target key start
LH: loop header
LB: loop body
LE: loop exit
PB: predicated region body
PF: predicated region fallthrough
CT: control target
= control target key end

     0   :  { %vm31_vm0 = vcmask 130048   ;;  %vm130_vm1 = vcmask 523264   ;;  %s366_s1 = inlined_call_operand.vmem [shape: f32[16,64], index: 1, kind: input, shape index: {}]   ;;  %s367_s0 = inlined_call_operand.vmem [shape: f32[16,16], index: 0, kind: input, shape index: {}]   ;;  %s368_s3 = inlined_call_operand.vmem [shape: f32[64,128], index: 3, kind: input, shape index: {}]   ;;  %s369_s2 = inlined_call_operand.vmem [shape: f32[1,64], index: 2, kind: input, shape index: {}]   ;;  %s370_s4 = inlined_call_operand.vmem [shape: f32[1,128], index: 4, kind: input, shape index: {}]   ;;  %s371_s5 = inlined_call_operand.vmem [shape: f32[16,128], index: 5, kind: output, shape index: {}]  }
   0x1   :  { %v22_v0 = vld [vmem:[%s366_s1] sm:$0xff]  ;;  %v23_v1 = vld [vmem:[%s366_s1 + $0x8] sm:$0xff]  ;;  %v117_v8 = vld [vmem:[%s368_s3 + $0x10] sm:$0xff] }
   0x2   :  { %v20_v2 = vld [vmem:[%s367_s0] sm:$0xff]  ;;  %v264_v3 = vpack.c.bf16 %v23_v1, %v22_v0  ;;  %v21_v4 = vld [vmem:[%s367_s0 + $0x8] sm:$0xff]  ;;  %v118_v9 = vld [vmem:[%s368_s3 + $0x18] sm:$0xff] }
   0x3   :  { %242 = vmatprep.mubr.msk.f32.mxu0 %vm31_vm0, %v20_v2  ;;  %v115_v5 = vld [vmem:[%s368_s3] sm:$0xff]  ;;  %v116_v6 = vld [vmem:[%s368_s3 + $0x8] sm:$0xff]  ;;  %v272_v10 = vpack.c.bf16 %v118_v9, %v117_v8  ;;  %v121_v13 = vld [vmem:[%s368_s3 + $0x30] sm:$0xff] }
   0x4   :  { %265 = vmatprep.subr.bf16.mxu0 %v264_v3  ;;  %v268_v7 = vpack.c.bf16 %v116_v6, %v115_v5  ;;  %v119_v11 = vld [vmem:[%s368_s3 + $0x20] sm:$0xff]  ;;  %v120_v12 = vld [vmem:[%s368_s3 + $0x28] sm:$0xff]  ;;  %v122_v15 = vld [vmem:[%s368_s3 + $0x38] sm:$0xff] }
   0x5   :  { %267 = vmatpush3.bf16.msra.mxu0 %v264_v3  ;;  %v276_v14 = vpack.c.bf16 %v120_v12, %v119_v11  ;;  %v280_v16 = vpack.c.bf16 %v122_v15, %v121_v13  ;;  %v218_v17 = vld [vmem:[%s369_s2] ss:$0 sm:$0xff] }
   0x6   :  { %269 = vmatprep.subr.bf16.mxu1 %v268_v7  ;;  %v221_v24 = vld [vmem:[%s370_s4] ss:$0 sm:$0xff] }
   0x7   :  { %271 = vmatpush3.bf16.msra.mxu1 %v268_v7 }
   0x8   :  { %243 = vmatmul.mubr.msk.f32.vlgmr.msra.gmra.mrb[0].mxu0 %vm31_vm0, %v21_v4  ;;  %273 = vmatprep.subr.bf16.mxu1 %v272_v10 }
   0xb   :  { %275 = vmatpush3.bf16.msra.mxu1 %v272_v10 }
   0xc   :  { %277 = vmatprep.subr.bf16.mxu1 %v276_v14 }
   0xf   :  { %279 = vmatpush3.bf16.msra.mxu1 %v276_v14 }
  0x10   :  { %281 = vmatprep.subr.bf16.mxu1 %v280_v16 }
  0x13   :  { %283 = vmatpush3.bf16.msra.mxu1 %v280_v16 }
  0xdb   :  { %v244_v18 = vpop.f32.mrb[0].mxu0 }
  0xdc   :  { %v110_v19 = vadd.f32 %v244_v18, %v218_v17  ;;  %v104_v20 = vpop.f32.mrb[1].mxu0 }
  0xdd   :  { %v105_v21 = vadd.f32 %v218_v17, %v104_v20 }
  0xdf   :  { %284 = vtanh.f32 %v105_v21 }
  0xe0   :  { %286 = vtanh.f32 %v110_v19 }
  0xe9   :  { %v285_v22 = vpop.eup %284 }
  0xea   :  { %v287_v23 = vpop.eup %286  ;;  %261 = vmatprep.mubr.msk.f32.mxu1 %vm130_vm1, %v285_v22 }
  0xeb   :  { %262 = vmatmul.mubr.msk.f32.vlgmr.msra.gmra.mrb[0].mxu1 %vm130_vm1, %v287_v23 }
 0x1be   :  { %v263_v25 = vpop.f32.mrb[0].mxu1 }
 0x1bf   :  { %v209_v26 = vadd.f32 %v263_v25, %v221_v24  ;;  %v203_v27 = vpop.f32.mrb[1].mxu1 }
 0x1c0   :  { %v204_v28 = vadd.f32 %v221_v24, %v203_v27 }
 0x1c1   :  { %213 = vst [vmem:[%s371_s5 + $0x8] sm:$0xff] %v209_v26 }
 0x1c2   :  { %212 = vst [vmem:[%s371_s5] sm:$0xff] %v204_v28 }

</bundles_post_ra>
